<compile_context>
chip_gen: v5e
topology: v5e:2x2
jax: 0.10.0
libtpu: 0.0.40
codegen_flags: <defaults>
</compile_context>

<pallas_src>
import jax
import jax.numpy as jnp
import numpy as np
from jax.experimental import pallas as pl
from jax.experimental.pallas import tpu as pltpu


def _round_up(x, m):
    return ((x + m - 1) // m) * m


def nig_kernel(x_ref, w1_ref, b1_ref, w2_ref, b2_ref, w3_ref, b3_ref,
               ev_ref, one_ref, out_ref):
    # Cast activations to bf16 in-kernel (VALU cast hides under the MXU).
    x = x_ref[...].astype(jnp.bfloat16)
    # fc1 + ReLU (bf16 operands, f32 accumulation on the MXU)
    h1 = jnp.dot(x, w1_ref[...], preferred_element_type=jnp.float32)
    h1 = jnp.maximum(h1 + b1_ref[...], 0.0).astype(jnp.bfloat16)
    # fc2 + ReLU
    h2 = jnp.dot(h1, w2_ref[...], preferred_element_type=jnp.float32)
    h2 = jnp.maximum(h2 + b2_ref[...], 0.0).astype(jnp.bfloat16)
    # Head; columns pre-permuted to [ mu | log_v | log_alpha | log_beta ].
    out = jnp.dot(h2, w3_ref[...], preferred_element_type=jnp.float32) + b3_ref[...]
    # Stable softplus == log(1 + exp(x)); one select against the precomputed
    # evidence-column mask row + one add of the alpha "+1" row.
    sp = jnp.maximum(out, 0.0) + jnp.log1p(jnp.exp(-jnp.abs(out)))
    out_ref[...] = jnp.where(ev_ref[...] != 0.0, sp, out) + one_ref[...]


def _vmem_estimate(tb, dim_in, h_p, n_out, buffered_weights):
    """Rough VMEM footprint (bytes) for one grid step."""
    wbuf = 1 if buffered_weights else 2
    weights = wbuf * 2 * (dim_in * h_p + h_p * h_p + h_p * n_out)   # bf16 weights
    consts = wbuf * 4 * (2 * h_p + 3 * n_out)                       # f32 bias/mask rows
    x_tiles = 2 * tb * dim_in * 4                                   # f32 x, double-buffered
    o_tiles = 2 * tb * n_out * 4                                    # f32 out, double-buffered
    temps = tb * h_p * (4 + 2) * 2 + 3 * tb * n_out * 4             # h1/h2 (f32+bf16), out/sp
    return weights + consts + x_tiles + o_tiles + temps


def _choose_tb(B, dim_in, h_p, n_out):
    if B <= 8:
        return max(B, 1)
    # At least 2 grid steps so the "parallel" batch axis can use both v7x
    # TensorCores, while keeping the ragged (masked) last tile small.
    tb = min(512, _round_up(pl.cdiv(B, 2), 8))
    budget = 40 << 20   # conservative; fits v5e/v6e/v7x once the scoped limit is raised
    while tb > 8 and _vmem_estimate(tb, dim_in, h_p, n_out, True) > budget:
        tb = _round_up(tb // 2, 8)
    return tb


def nig_forward_packed(x, prepared):
    """x: (B, dim_in). Returns packed (B, 4*dim_out) f32 laid out as
    [ mu | softplus(log_v) | softplus(log_alpha)+1 | softplus(log_beta) ]."""
    w1, b1, w2, b2, w3, b3, ev_row, one_row = prepared
    B, dim_in = x.shape
    h_p = w1.shape[1]
    n_out = w3.shape[1]

    tb = _choose_tb(B, dim_in, h_p, n_out)
    grid = (pl.cdiv(B, tb),)

    cost = pl.CostEstimate(
        flops=2 * B * (dim_in * h_p + h_p * h_p + h_p * n_out),
        transcendentals=2 * B * n_out,
        bytes_accessed=(x.size * x.dtype.itemsize
                        + (w1.size + w2.size + w3.size) * 2
                        + (b1.size + b2.size + b3.size + ev_row.size + one_row.size) * 4
                        + B * n_out * 4),
    )

    def build(buffered_weights):
        def row_spec(shape):
            return pl.BlockSpec(shape, lambda i: (i, 0))

        def const_spec(shape):
            if buffered_weights:
                # Constant across the grid -> a single VMEM buffer is enough.
                return pl.BlockSpec(shape, lambda i: (0, 0),
                                    pipeline_mode=pl.Buffered(1))
            return pl.BlockSpec(shape, lambda i: (0, 0))

        est = _vmem_estimate(tb, dim_in, h_p, n_out, buffered_weights)
        vmem_limit = int(min(60 << 20, max(24 << 20, 2 * est)))

        return pl.pallas_call(
            nig_kernel,
            out_shape=jax.ShapeDtypeStruct((B, n_out), jnp.float32),
            grid=grid,
            in_specs=[
                row_spec((tb, dim_in)),      # x tile (ragged last tile is masked)
                const_spec((dim_in, h_p)),   # w1 (bf16, VMEM-resident)
                const_spec((1, h_p)),        # b1 (f32)
                const_spec((h_p, h_p)),      # w2
                const_spec((1, h_p)),        # b2
                const_spec((h_p, n_out)),    # w3 (head-permuted)
                const_spec((1, n_out)),      # b3
                const_spec((1, n_out)),      # evidence-column mask row
                const_spec((1, n_out)),      # alpha "+1" row
            ],
            out_specs=row_spec((tb, n_out)),
            compiler_params=pltpu.CompilerParams(
                dimension_semantics=("parallel",),
                vmem_limit_bytes=vmem_limit),
            cost_estimate=cost,
        )

    args = (x, w1, b1, w2, b2, w3, b3, ev_row, one_row)
    try:
        return build(True)(*args)
    except Exception:
        # Fallback if this runtime rejects single-buffered (Buffered(1)) specs.
        return build(False)(*args)


def nig_forward(x, prepared, dim_out):
    """Returns (mu, v, alpha, beta), each (B, dim_out) f32.  The split is a
    lazy slice of the packed kernel output (fuses with consumers under jit)."""
    packed = nig_forward_packed(x, prepared)
    d = dim_out
    return (packed[:, 0 * d:1 * d], packed[:, 1 * d:2 * d],
            packed[:, 2 * d:3 * d], packed[:, 3 * d:4 * d])


def init_params(key, dim_in, dim_out, hidden_dim):
    """Deterministic PyTorch-Linear-style init; weights stored as (in, out), f32."""
    ks = jax.random.split(key, 6)

    def linear(kw, kb, fan_in, fan_out):
        bound = 1.0 / np.sqrt(fan_in)
        w = jax.random.uniform(kw, (fan_in, fan_out), jnp.float32, -bound, bound)
        b = jax.random.uniform(kb, (1, fan_out), jnp.float32, -bound, bound)
        return w, b

    w1, b1 = linear(ks[0], ks[1], dim_in, hidden_dim)
    w2, b2 = linear(ks[2], ks[3], hidden_dim, hidden_dim)
    w3, b3 = linear(ks[4], ks[5], hidden_dim, dim_out * 4)
    return (w1, b1, w2, b2, w3, b3)


def prepare_params(params, dim_in, dim_out, hidden_dim):
    """One-time: permute head columns, pad hidden to a 128 multiple, cast
    weights to bf16, and build the epilogue mask rows."""
    w1, b1, w2, b2, w3, b3 = params
    n_out = 4 * dim_out

    # new column c*dim_out + j  <-  old column j*4 + c  (matches .view(B,-1,4)+split)
    perm = np.arange(n_out).reshape(dim_out, 4).T.reshape(-1)
    w3 = w3[:, perm]
    b3 = b3[:, perm]

    h_p = _round_up(hidden_dim, 128)

    def pad2(a, r, c):
        return jnp.zeros((r, c), a.dtype).at[:a.shape[0], :a.shape[1]].set(a)

    w1p = pad2(w1, dim_in, h_p).astype(jnp.bfloat16)
    w2p = pad2(w2, h_p, h_p).astype(jnp.bfloat16)
    w3p = pad2(w3, h_p, n_out).astype(jnp.bfloat16)
    b1p = pad2(b1, 1, h_p)            # biases stay f32 (added to f32 accumulators)
    b2p = pad2(b2, 1, h_p)
    b3p = jnp.asarray(b3, jnp.float32)

    col = np.arange(n_out)
    ev_row = jnp.asarray(((col >= dim_out)).astype(np.float32)[None, :])            # softplus cols
    one_row = jnp.asarray(((col >= 2 * dim_out) & (col < 3 * dim_out))
                          .astype(np.float32)[None, :])                              # alpha +1 cols
    return (w1p, b1p, w2p, b2p, w3p, b3p, ev_row, one_row)


def reference_forward(x, params, dim_out):
    """Pure-JAX f32 reference mirroring the PyTorch module (stable softplus)."""
    w1, b1, w2, b2, w3, b3 = params
    h = jnp.maximum(x @ w1 + b1, 0.0)
    h = jnp.maximum(h @ w2 + b2, 0.0)
    out = (h @ w3 + b3).reshape(x.shape[0], -1, 4)
    mu, log_v, log_a, log_b = [out[..., i] for i in range(4)]
    sp = jax.nn.softplus
    return mu, sp(log_v), sp(log_a) + 1.0, sp(log_b)


if __name__ == "__main__":
    B, dim_in, hidden_dim, dim_out = 8, 16, 32, 4

    key = jax.random.PRNGKey(0)
    kx, kp = jax.random.split(key)
    x = jax.random.normal(kx, (B, dim_in), jnp.float32)
    params = init_params(kp, dim_in, dim_out, hidden_dim)
    prepared = prepare_params(params, dim_in, dim_out, hidden_dim)

    mu, v, alpha, beta = nig_forward(x, prepared, dim_out)
    jax.block_until_ready((mu, v, alpha, beta))

    # Correctness vs the f32 reference (tolerance loosened for bf16 matmul operands).
    r_mu, r_v, r_a, r_b = reference_forward(x, params, dim_out)
    tol = dict(rtol=5e-2, atol=5e-2)
    np.testing.assert_allclose(np.asarray(mu), np.asarray(r_mu), **tol)
    np.testing.assert_allclose(np.asarray(v), np.asarray(r_v), **tol)
    np.testing.assert_allclose(np.asarray(alpha), np.asarray(r_a), **tol)
    np.testing.assert_allclose(np.asarray(beta), np.asarray(r_b), **tol)

    print("KERNEL_OK")
</pallas_src>

<mosaic_0001>
module attributes {stable_mosaic.version = 11 : i64} {
  func.func @nig_kernel(%arg0: i32, %arg1: memref<8x16xf32, #tpu.memory_space<vmem>>, %arg2: memref<16x128xbf16, #tpu.memory_space<vmem>>, %arg3: memref<1x128xf32, #tpu.memory_space<vmem>>, %arg4: memref<128x128xbf16, #tpu.memory_space<vmem>>, %arg5: memref<1x128xf32, #tpu.memory_space<vmem>>, %arg6: memref<128x16xbf16, #tpu.memory_space<vmem>>, %arg7: memref<1x16xf32, #tpu.memory_space<vmem>>, %arg8: memref<1x16xf32, #tpu.memory_space<vmem>>, %arg9: memref<1x16xf32, #tpu.memory_space<vmem>>, %arg10: memref<8x16xf32, #tpu.memory_space<vmem>>) attributes {dimension_semantics = [#tpu.dimension_semantics<parallel>], iteration_bounds = array<i64: 1>, scalar_prefetch = 0 : i64, scratch_operands = 0 : i64, tpu.core_type = #tpu.core_type<tc>, window_params = [{transform_indices = @transform_0, window_bounds = array<i64: 8, 16>}, {pipeline_mode = #tpu.pipeline_mode<synchronous>, transform_indices = @transform_1, window_bounds = array<i64: 16, 128>}, {pipeline_mode = #tpu.pipeline_mode<synchronous>, transform_indices = @transform_2, window_bounds = array<i64: 1, 128>}, {pipeline_mode = #tpu.pipeline_mode<synchronous>, transform_indices = @transform_3, window_bounds = array<i64: 128, 128>}, {pipeline_mode = #tpu.pipeline_mode<synchronous>, transform_indices = @transform_4, window_bounds = array<i64: 1, 128>}, {pipeline_mode = #tpu.pipeline_mode<synchronous>, transform_indices = @transform_5, window_bounds = array<i64: 128, 16>}, {pipeline_mode = #tpu.pipeline_mode<synchronous>, transform_indices = @transform_6, window_bounds = array<i64: 1, 16>}, {pipeline_mode = #tpu.pipeline_mode<synchronous>, transform_indices = @transform_7, window_bounds = array<i64: 1, 16>}, {pipeline_mode = #tpu.pipeline_mode<synchronous>, transform_indices = @transform_8, window_bounds = array<i64: 1, 16>}, {transform_indices = @transform_9, window_bounds = array<i64: 8, 16>}]} {
    %c0 = arith.constant 0 : index
    %c0_0 = arith.constant 0 : index
    %0 = vector.load %arg1[%c0, %c0_0] : memref<8x16xf32, #tpu.memory_space<vmem>>, vector<8x16xf32>
    %1 = arith.truncf %0 : vector<8x16xf32> to vector<8x16xbf16>
    %c0_1 = arith.constant 0 : index
    %c0_2 = arith.constant 0 : index
    %2 = vector.load %arg2[%c0_1, %c0_2] : memref<16x128xbf16, #tpu.memory_space<vmem>>, vector<16x128xbf16>
    %cst = arith.constant dense<0.000000e+00> : vector<8x128xf32>
    %3 = tpu.matmul %1, %2, %cst {dimension_numbers = #tpu.dot_dimension_numbers<[1], [0], [0], [1], [0, 0, 1, 1], [], []>} : vector<8x16xbf16>, vector<16x128xbf16>, vector<8x128xf32> -> vector<8x128xf32>
    %c0_3 = arith.constant 0 : index
    %c0_4 = arith.constant 0 : index
    %4 = vector.load %arg3[%c0_3, %c0_4] : memref<1x128xf32, #tpu.memory_space<vmem>>, vector<1x128xf32>
    %5 = vector.broadcast %4 : vector<1x128xf32> to vector<8x128xf32>
    %6 = arith.addf %3, %5 : vector<8x128xf32>
    %cst_5 = arith.constant 0.000000e+00 : f32
    %7 = vector.broadcast %cst_5 : f32 to vector<8x128xf32>
    %8 = arith.maximumf %6, %7 : vector<8x128xf32>
    %9 = arith.truncf %8 : vector<8x128xf32> to vector<8x128xbf16>
    %c0_6 = arith.constant 0 : index
    %c0_7 = arith.constant 0 : index
    %10 = vector.load %arg4[%c0_6, %c0_7] : memref<128x128xbf16, #tpu.memory_space<vmem>>, vector<128x128xbf16>
    %cst_8 = arith.constant dense<0.000000e+00> : vector<8x128xf32>
    %11 = tpu.matmul %9, %10, %cst_8 {dimension_numbers = #tpu.dot_dimension_numbers<[1], [0], [0], [1], [0, 0, 1, 1], [], []>} : vector<8x128xbf16>, vector<128x128xbf16>, vector<8x128xf32> -> vector<8x128xf32>
    %c0_9 = arith.constant 0 : index
    %c0_10 = arith.constant 0 : index
    %12 = vector.load %arg5[%c0_9, %c0_10] : memref<1x128xf32, #tpu.memory_space<vmem>>, vector<1x128xf32>
    %13 = vector.broadcast %12 : vector<1x128xf32> to vector<8x128xf32>
    %14 = arith.addf %11, %13 : vector<8x128xf32>
    %cst_11 = arith.constant 0.000000e+00 : f32
    %15 = vector.broadcast %cst_11 : f32 to vector<8x128xf32>
    %16 = arith.maximumf %14, %15 : vector<8x128xf32>
    %17 = arith.truncf %16 : vector<8x128xf32> to vector<8x128xbf16>
    %c0_12 = arith.constant 0 : index
    %c0_13 = arith.constant 0 : index
    %18 = vector.load %arg6[%c0_12, %c0_13] : memref<128x16xbf16, #tpu.memory_space<vmem>>, vector<128x16xbf16>
    %cst_14 = arith.constant dense<0.000000e+00> : vector<8x16xf32>
    %19 = tpu.matmul %17, %18, %cst_14 {dimension_numbers = #tpu.dot_dimension_numbers<[1], [0], [0], [1], [0, 0, 1, 1], [], []>} : vector<8x128xbf16>, vector<128x16xbf16>, vector<8x16xf32> -> vector<8x16xf32>
    %c0_15 = arith.constant 0 : index
    %c0_16 = arith.constant 0 : index
    %20 = vector.load %arg7[%c0_15, %c0_16] : memref<1x16xf32, #tpu.memory_space<vmem>>, vector<1x16xf32>
    %21 = vector.broadcast %20 : vector<1x16xf32> to vector<8x16xf32>
    %22 = arith.addf %19, %21 : vector<8x16xf32>
    %cst_17 = arith.constant 0.000000e+00 : f32
    %23 = vector.broadcast %cst_17 : f32 to vector<8x16xf32>
    %24 = arith.maximumf %22, %23 : vector<8x16xf32>
    %25 = math.absf %22 : vector<8x16xf32>
    %cst_18 = arith.constant 0.000000e+00 : f32
    %26 = vector.broadcast %cst_18 : f32 to vector<8x16xf32>
    %27 = arith.subf %26, %25 : vector<8x16xf32>
    %28 = math.exp %27 : vector<8x16xf32>
    %29 = math.log1p %28 : vector<8x16xf32>
    %30 = arith.addf %24, %29 : vector<8x16xf32>
    %c0_19 = arith.constant 0 : index
    %c0_20 = arith.constant 0 : index
    %31 = vector.load %arg8[%c0_19, %c0_20] : memref<1x16xf32, #tpu.memory_space<vmem>>, vector<1x16xf32>
    %cst_21 = arith.constant 0.000000e+00 : f32
    %32 = vector.broadcast %cst_21 : f32 to vector<1x16xf32>
    %33 = arith.cmpf one, %31, %32 : vector<1x16xf32>
    %34 = vector.shape_cast %33 : vector<1x16xi1> to vector<1x16xi1>
    %35 = vector.broadcast %34 : vector<1x16xi1> to vector<8x16xi1>
    %36 = arith.select %35, %30, %22 : vector<8x16xi1>, vector<8x16xf32>
    %c0_22 = arith.constant 0 : index
    %c0_23 = arith.constant 0 : index
    %37 = vector.load %arg9[%c0_22, %c0_23] : memref<1x16xf32, #tpu.memory_space<vmem>>, vector<1x16xf32>
    %38 = vector.broadcast %37 : vector<1x16xf32> to vector<8x16xf32>
    %39 = arith.addf %36, %38 : vector<8x16xf32>
    %c0_24 = arith.constant 0 : index
    %c0_25 = arith.constant 0 : index
    %40 = vector.load %arg10[%c0_24, %c0_25] : memref<8x16xf32, #tpu.memory_space<vmem>>, vector<8x16xf32>
    tpu.vector_store %arg10[%c0_24, %c0_25], %39 {strides = array<i32>} : memref<8x16xf32, #tpu.memory_space<vmem>>, vector<8x16xf32>,
    return
  }
  func.func @transform_0(%arg0: i32) -> (i32, i32) {
    %c0_i32 = arith.constant 0 : i32
    %c0_i32_0 = arith.constant 0 : i32
    return %arg0, %c0_i32 : i32, i32
  }
  func.func @transform_1(%arg0: i32) -> (i32, i32) {
    %c0_i32 = arith.constant 0 : i32
    %c0_i32_0 = arith.constant 0 : i32
    %c0_i32_1 = arith.constant 0 : i32
    return %c0_i32, %c0_i32_0 : i32, i32
  }
  func.func @transform_2(%arg0: i32) -> (i32, i32) {
    %c0_i32 = arith.constant 0 : i32
    %c0_i32_0 = arith.constant 0 : i32
    %c0_i32_1 = arith.constant 0 : i32
    return %c0_i32, %c0_i32_0 : i32, i32
  }
  func.func @transform_3(%arg0: i32) -> (i32, i32) {
    %c0_i32 = arith.constant 0 : i32
    %c0_i32_0 = arith.constant 0 : i32
    %c0_i32_1 = arith.constant 0 : i32
    return %c0_i32, %c0_i32_0 : i32, i32
  }
  func.func @transform_4(%arg0: i32) -> (i32, i32) {
    %c0_i32 = arith.constant 0 : i32
    %c0_i32_0 = arith.constant 0 : i32
    %c0_i32_1 = arith.constant 0 : i32
    return %c0_i32, %c0_i32_0 : i32, i32
  }
  func.func @transform_5(%arg0: i32) -> (i32, i32) {
    %c0_i32 = arith.constant 0 : i32
    %c0_i32_0 = arith.constant 0 : i32
    %c0_i32_1 = arith.constant 0 : i32
    return %c0_i32, %c0_i32_0 : i32, i32
  }
  func.func @transform_6(%arg0: i32) -> (i32, i32) {
    %c0_i32 = arith.constant 0 : i32
    %c0_i32_0 = arith.constant 0 : i32
    %c0_i32_1 = arith.constant 0 : i32
    return %c0_i32, %c0_i32_0 : i32, i32
  }
  func.func @transform_7(%arg0: i32) -> (i32, i32) {
    %c0_i32 = arith.constant 0 : i32
    %c0_i32_0 = arith.constant 0 : i32
    %c0_i32_1 = arith.constant 0 : i32
    return %c0_i32, %c0_i32_0 : i32, i32
  }
  func.func @transform_8(%arg0: i32) -> (i32, i32) {
    %c0_i32 = arith.constant 0 : i32
    %c0_i32_0 = arith.constant 0 : i32
    %c0_i32_1 = arith.constant 0 : i32
    return %c0_i32, %c0_i32_0 : i32, i32
  }
  func.func @transform_9(%arg0: i32) -> (i32, i32) {
    %c0_i32 = arith.constant 0 : i32
    %c0_i32_0 = arith.constant 0 : i32
    return %arg0, %c0_i32 : i32, i32
  }
}

module attributes {stable_mosaic.version = 11 : i64} {
  func.func @nig_kernel(%arg0: i32, %arg1: memref<8x16xf32, #tpu.memory_space<vmem>>, %arg2: memref<16x128xbf16, #tpu.memory_space<vmem>>, %arg3: memref<1x128xf32, #tpu.memory_space<vmem>>, %arg4: memref<128x128xbf16, #tpu.memory_space<vmem>>, %arg5: memref<1x128xf32, #tpu.memory_space<vmem>>, %arg6: memref<128x16xbf16, #tpu.memory_space<vmem>>, %arg7: memref<1x16xf32, #tpu.memory_space<vmem>>, %arg8: memref<1x16xf32, #tpu.memory_space<vmem>>, %arg9: memref<1x16xf32, #tpu.memory_space<vmem>>, %arg10: memref<8x16xf32, #tpu.memory_space<vmem>>) attributes {dimension_semantics = [#tpu.dimension_semantics<parallel>], iteration_bounds = array<i64: 1>, scalar_prefetch = 0 : i64, scratch_operands = 0 : i64, tpu.core_type = #tpu.core_type<tc>, window_params = [{transform_indices = @transform_0, window_bounds = array<i64: 8, 16>}, {pipeline_mode = #tpu.pipeline_mode<synchronous>, transform_indices = @transform_1, window_bounds = array<i64: 16, 128>}, {pipeline_mode = #tpu.pipeline_mode<synchronous>, transform_indices = @transform_2, window_bounds = array<i64: 1, 128>}, {pipeline_mode = #tpu.pipeline_mode<synchronous>, transform_indices = @transform_3, window_bounds = array<i64: 128, 128>}, {pipeline_mode = #tpu.pipeline_mode<synchronous>, transform_indices = @transform_4, window_bounds = array<i64: 1, 128>}, {pipeline_mode = #tpu.pipeline_mode<synchronous>, transform_indices = @transform_5, window_bounds = array<i64: 128, 16>}, {pipeline_mode = #tpu.pipeline_mode<synchronous>, transform_indices = @transform_6, window_bounds = array<i64: 1, 16>}, {pipeline_mode = #tpu.pipeline_mode<synchronous>, transform_indices = @transform_7, window_bounds = array<i64: 1, 16>}, {pipeline_mode = #tpu.pipeline_mode<synchronous>, transform_indices = @transform_8, window_bounds = array<i64: 1, 16>}, {transform_indices = @transform_9, window_bounds = array<i64: 8, 16>}]} {
    %c0 = arith.constant 0 : index
    %c0_0 = arith.constant 0 : index
    %0 = vector.load %arg1[%c0, %c0_0] : memref<8x16xf32, #tpu.memory_space<vmem>>, vector<8x16xf32>
    %1 = arith.truncf %0 : vector<8x16xf32> to vector<8x16xbf16>
    %c0_1 = arith.constant 0 : index
    %c0_2 = arith.constant 0 : index
    %2 = vector.load %arg2[%c0_1, %c0_2] : memref<16x128xbf16, #tpu.memory_space<vmem>>, vector<16x128xbf16>
    %cst = arith.constant dense<0.000000e+00> : vector<8x128xf32>
    %3 = tpu.matmul %1, %2, %cst {dimension_numbers = #tpu.dot_dimension_numbers<[1], [0], [0], [1], [0, 0, 1, 1], [], []>} : vector<8x16xbf16>, vector<16x128xbf16>, vector<8x128xf32> -> vector<8x128xf32>
    %c0_3 = arith.constant 0 : index
    %c0_4 = arith.constant 0 : index
    %4 = vector.load %arg3[%c0_3, %c0_4] : memref<1x128xf32, #tpu.memory_space<vmem>>, vector<1x128xf32>
    %5 = vector.broadcast %4 : vector<1x128xf32> to vector<8x128xf32>
    %6 = arith.addf %3, %5 : vector<8x128xf32>
    %cst_5 = arith.constant 0.000000e+00 : f32
    %7 = vector.broadcast %cst_5 : f32 to vector<8x128xf32>
    %8 = arith.maximumf %6, %7 : vector<8x128xf32>
    %9 = arith.truncf %8 : vector<8x128xf32> to vector<8x128xbf16>
    %c0_6 = arith.constant 0 : index
    %c0_7 = arith.constant 0 : index
    %10 = vector.load %arg4[%c0_6, %c0_7] : memref<128x128xbf16, #tpu.memory_space<vmem>>, vector<128x128xbf16>
    %cst_8 = arith.constant dense<0.000000e+00> : vector<8x128xf32>
    %11 = tpu.matmul %9, %10, %cst_8 {dimension_numbers = #tpu.dot_dimension_numbers<[1], [0], [0], [1], [0, 0, 1, 1], [], []>} : vector<8x128xbf16>, vector<128x128xbf16>, vector<8x128xf32> -> vector<8x128xf32>
    %c0_9 = arith.constant 0 : index
    %c0_10 = arith.constant 0 : index
    %12 = vector.load %arg5[%c0_9, %c0_10] : memref<1x128xf32, #tpu.memory_space<vmem>>, vector<1x128xf32>
    %13 = vector.broadcast %12 : vector<1x128xf32> to vector<8x128xf32>
    %14 = arith.addf %11, %13 : vector<8x128xf32>
    %cst_11 = arith.constant 0.000000e+00 : f32
    %15 = vector.broadcast %cst_11 : f32 to vector<8x128xf32>
    %16 = arith.maximumf %14, %15 : vector<8x128xf32>
    %17 = arith.truncf %16 : vector<8x128xf32> to vector<8x128xbf16>
    %c0_12 = arith.constant 0 : index
    %c0_13 = arith.constant 0 : index
    %18 = vector.load %arg6[%c0_12, %c0_13] : memref<128x16xbf16, #tpu.memory_space<vmem>>, vector<128x16xbf16>
    %cst_14 = arith.constant dense<0.000000e+00> : vector<8x16xf32>
    %19 = tpu.matmul %17, %18, %cst_14 {dimension_numbers = #tpu.dot_dimension_numbers<[1], [0], [0], [1], [0, 0, 1, 1], [], []>} : vector<8x128xbf16>, vector<128x16xbf16>, vector<8x16xf32> -> vector<8x16xf32>
    %c0_15 = arith.constant 0 : index
    %c0_16 = arith.constant 0 : index
    %20 = vector.load %arg7[%c0_15, %c0_16] : memref<1x16xf32, #tpu.memory_space<vmem>>, vector<1x16xf32>
    %21 = vector.broadcast %20 : vector<1x16xf32> to vector<8x16xf32>
    %22 = arith.addf %19, %21 : vector<8x16xf32>
    %cst_17 = arith.constant 0.000000e+00 : f32
    %23 = vector.broadcast %cst_17 : f32 to vector<8x16xf32>
    %24 = arith.maximumf %22, %23 : vector<8x16xf32>
    %25 = math.absf %22 : vector<8x16xf32>
    %cst_18 = arith.constant 0.000000e+00 : f32
    %26 = vector.broadcast %cst_18 : f32 to vector<8x16xf32>
    %27 = arith.subf %26, %25 : vector<8x16xf32>
    %28 = math.exp %27 : vector<8x16xf32>
    %29 = math.log1p %28 : vector<8x16xf32>
    %30 = arith.addf %24, %29 : vector<8x16xf32>
    %c0_19 = arith.constant 0 : index
    %c0_20 = arith.constant 0 : index
    %31 = vector.load %arg8[%c0_19, %c0_20] : memref<1x16xf32, #tpu.memory_space<vmem>>, vector<1x16xf32>
    %cst_21 = arith.constant 0.000000e+00 : f32
    %32 = vector.broadcast %cst_21 : f32 to vector<1x16xf32>
    %33 = arith.cmpf one, %31, %32 : vector<1x16xf32>
    %34 = vector.shape_cast %33 : vector<1x16xi1> to vector<1x16xi1>
    %35 = vector.broadcast %34 : vector<1x16xi1> to vector<8x16xi1>
    %36 = arith.select %35, %30, %22 : vector<8x16xi1>, vector<8x16xf32>
    %c0_22 = arith.constant 0 : index
    %c0_23 = arith.constant 0 : index
    %37 = vector.load %arg9[%c0_22, %c0_23] : memref<1x16xf32, #tpu.memory_space<vmem>>, vector<1x16xf32>
    %38 = vector.broadcast %37 : vector<1x16xf32> to vector<8x16xf32>
    %39 = arith.addf %36, %38 : vector<8x16xf32>
    %c0_24 = arith.constant 0 : index
    %c0_25 = arith.constant 0 : index
    %40 = vector.load %arg10[%c0_24, %c0_25] : memref<8x16xf32, #tpu.memory_space<vmem>>, vector<8x16xf32>
    tpu.vector_store %arg10[%c0_24, %c0_25], %39 {strides = array<i32>} : memref<8x16xf32, #tpu.memory_space<vmem>>, vector<8x16xf32>,
    return
  }
  func.func @transform_0(%arg0: i32) -> (i32, i32) {
    %c0_i32 = arith.constant 0 : i32
    %c0_i32_0 = arith.constant 0 : i32
    return %arg0, %c0_i32 : i32, i32
  }
  func.func @transform_1(%arg0: i32) -> (i32, i32) {
    %c0_i32 = arith.constant 0 : i32
    %c0_i32_0 = arith.constant 0 : i32
    %c0_i32_1 = arith.constant 0 : i32
    return %c0_i32, %c0_i32_0 : i32, i32
  }
  func.func @transform_2(%arg0: i32) -> (i32, i32) {
    %c0_i32 = arith.constant 0 : i32
    %c0_i32_0 = arith.constant 0 : i32
    %c0_i32_1 = arith.constant 0 : i32
    return %c0_i32, %c0_i32_0 : i32, i32
  }
  func.func @transform_3(%arg0: i32) -> (i32, i32) {
    %c0_i32 = arith.constant 0 : i32
    %c0_i32_0 = arith.constant 0 : i32
    %c0_i32_1 = arith.constant 0 : i32
    return %c0_i32, %c0_i32_0 : i32, i32
  }
  func.func @transform_4(%arg0: i32) -> (i32, i32) {
    %c0_i32 = arith.constant 0 : i32
    %c0_i32_0 = arith.constant 0 : i32
    %c0_i32_1 = arith.constant 0 : i32
    return %c0_i32, %c0_i32_0 : i32, i32
  }
  func.func @transform_5(%arg0: i32) -> (i32, i32) {
    %c0_i32 = arith.constant 0 : i32
    %c0_i32_0 = arith.constant 0 : i32
    %c0_i32_1 = arith.constant 0 : i32
    return %c0_i32, %c0_i32_0 : i32, i32
  }
  func.func @transform_6(%arg0: i32) -> (i32, i32) {
    %c0_i32 = arith.constant 0 : i32
    %c0_i32_0 = arith.constant 0 : i32
    %c0_i32_1 = arith.constant 0 : i32
    return %c0_i32, %c0_i32_0 : i32, i32
  }
  func.func @transform_7(%arg0: i32) -> (i32, i32) {
    %c0_i32 = arith.constant 0 : i32
    %c0_i32_0 = arith.constant 0 : i32
    %c0_i32_1 = arith.constant 0 : i32
    return %c0_i32, %c0_i32_0 : i32, i32
  }
  func.func @transform_8(%arg0: i32) -> (i32, i32) {
    %c0_i32 = arith.constant 0 : i32
    %c0_i32_0 = arith.constant 0 : i32
    %c0_i32_1 = arith.constant 0 : i32
    return %c0_i32, %c0_i32_0 : i32, i32
  }
  func.func @transform_9(%arg0: i32) -> (i32, i32) {
    %c0_i32 = arith.constant 0 : i32
    %c0_i32_0 = arith.constant 0 : i32
    return %arg0, %c0_i32 : i32, i32
  }
}

</mosaic_0001>

<bundles_post_ra>
// kernel: tpu_custom_call.1
= control target key start
LH: loop header
LB: loop body
LE: loop exit
PB: predicated region body
PF: predicated region fallthrough
CT: control target
= control target key end

     0   :  { %14 = vsyncpa [#allocation3], 0  ;;  %s571_s0 = inlined_call_operand.vmem [shape: f32[8,16], index: 0, kind: input, shape index: {}]   ;;  %s572_s1 = inlined_call_operand.hbm [shape: bf16[16,128], index: 1, kind: input, shape index: {}]   ;;  %s573_s2 = inlined_call_operand.vmem [shape: f32[1,128], index: 2, kind: input, shape index: {}]   ;;  %s574_s3 = inlined_call_operand.vmem [shape: bf16[128,128], index: 3, kind: input, shape index: {}]   ;;  %s575_s4 = inlined_call_operand.vmem [shape: f32[1,128], index: 4, kind: input, shape index: {}]   ;;  %s576_s5 = inlined_call_operand.vmem [shape: bf16[128,16], index: 5, kind: input, shape index: {}]   ;;  %s577_s6 = inlined_call_operand.vmem [shape: f32[1,16], index: 6, kind: input, shape index: {}]   ;;  %s578_s7 = inlined_call_operand.vmem [shape: f32[1,16], index: 7, kind: input, shape index: {}]   ;;  %s579_s8 = inlined_call_operand.vmem [shape: f32[1,16], index: 8, kind: input, shape index: {}]   ;;  %s580_s9 = inlined_call_operand.hbm [shape: f32[8,16], index: 9, kind: output, shape index: {}]  }
   0x1   :  { %15 = vsyncpa [#allocation4], 0  ;;  %s22_s11 = sshll.u32 %s572_s1, 4  ;;  %s442_s12 = smov [#allocation2]   ;;  %s23_s11 = int_to_ptr.hbm [resolvable:$true] %s22_s11 }
   0x2   :  { %s24_s13 = sshll.u32 %s442_s12, 4  ;;  %s443_s14 = smov 64   ;;  %s25_s13 = int_to_ptr.vmem [resolvable:$true] %s24_s13 }
   0x3   :  { %s444_s15 = smov 4  }
   0x4   :  { %30 = dma.hbm_to_vmem [thread:$0]  %s23_s11, 128, %s25_s13, [#allocation3], %s443_s14, %s443_s14, %s444_s15  }
   0x5   :  { %438 = dma.done.wait [#allocation3], 128  }
   0x6   :  { %439 = vsyncadd [#allocation3], 4294967168  ;;  %v360_v0 = vld [vmem:[#allocation2] sm:$0xff]  ;;  %v368_v2 = vld [vmem:[%s574_s3 + $0x38] sm:$0xff]  ;;  %vm64_vm0 = vcmask 130048   ;;  %v445_v42 = vmov 0  }
   0x7   :  { %v50_v1 = vld [vmem:[%s571_s0] sm:$0xff]  ;;  %75 = vmatpush.bf16.msra.mxu0 %v360_v0  ;;  %151 = vmatpush.bf16.msra.mxu1 %v368_v2  ;;  %v367_v4 = vld [vmem:[%s574_s3 + $0x30] sm:$0xff]  ;;  %v366_v5 = vld [vmem:[%s574_s3 + $0x28] sm:$0xff]  ;;  %s281_s12 = sshll.u32 %s580_s9, 4  ;;  %s282_s12 = int_to_ptr.hbm [resolvable:$true] %s281_s12 }
   0x8   :  { %v51_v3 = vpack.c.bf16 %v50_v1, %v50_v1  ;;  %v365_v6 = vld [vmem:[%s574_s3 + $0x20] sm:$0xff]  ;;  %v364_v7 = vld [vmem:[%s574_s3 + $0x18] sm:$0xff]  ;;  %v363_v8 = vld [vmem:[%s574_s3 + $0x10] sm:$0xff] }
   0x9   :  { %v362_v9 = vld [vmem:[%s574_s3 + $0x8] sm:$0xff]  ;;  %v361_v10 = vld [vmem:[%s574_s3] sm:$0xff]  ;;  %v376_v11 = vld [vmem:[%s576_s5 + $0x38] sm:$0xff] }
   0xa   :  { %295 = vmatmul.msk.bf16.vlgmr.msra.gmra.mxu0 %vm64_vm0, %v51_v3  ;;  %234 = vmatpush.bf16.msra.mxu2 %v376_v11  ;;  %v375_v12 = vld [vmem:[%s576_s5 + $0x30] sm:$0xff]  ;;  %v374_v13 = vld [vmem:[%s576_s5 + $0x28] sm:$0xff]  ;;  %v373_v14 = vld [vmem:[%s576_s5 + $0x20] sm:$0xff] }
   0xb   :  { %152 = vmatpush.bf16.msra.mxu1 %v367_v4  ;;  %v372_v15 = vld [vmem:[%s576_s5 + $0x18] sm:$0xff]  ;;  %v371_v16 = vld [vmem:[%s576_s5 + $0x10] sm:$0xff]  ;;  %v382_v17 = vld [vmem:[%s573_s2] ss:$0 sm:$0xff] }
   0xc   :  { %v370_v23 = vld [vmem:[%s576_s5 + $0x8] sm:$0xff]  ;;  %v369_v24 = vld [vmem:[%s576_s5] sm:$0xff] }
   0xd   :  { %v383_v25 = vld [vmem:[%s575_s4] ss:$0 sm:$0xff] }
   0xe   :  { %235 = vmatpush.bf16.msra.mxu2 %v375_v12  ;;  %v384_v31 = vld [vmem:[%s577_s6] ss:$0 sm:$0xff] }
   0xf   :  { %153 = vmatpush.bf16.msra.mxu1 %v366_v5  ;;  %v262_v38 = vld [vmem:[%s578_s7] sm:$0x1]  ;;  %s446_s7 = smov [#allocation5]  }
  0x10   :  { %vm263_vm1 = vcmp.ne.f32.partialorder %v262_v38, 0.0  ;;  %v385_v52 = vld [vmem:[%s579_s8] ss:$0 sm:$0xff]  ;;  %s279_s30 = sshll.u32 %s446_s7, 4  ;;  %s280_s30 = int_to_ptr.vmem [resolvable:$true] %s279_s30 }
  0x11   :  { %v264_v43 = vsel %vm263_vm1, 1, %v445_v42 }
  0x12   :  { %236 = vmatpush.bf16.msra.mxu2 %v374_v13  ;;  %v265_v46 = vperm.slane %v264_v43, 0 }
  0x13   :  { %154 = vmatpush.bf16.msra.mxu1 %v365_v6 }
  0x14   :  { %vm266_vm3 = vcmp.eq.s32.totalorder %v265_v46, 1 }
  0x16   :  { %237 = vmatpush.bf16.msra.mxu2 %v373_v14 }
  0x17   :  { %155 = vmatpush.bf16.msra.mxu1 %v364_v7 }
  0x1a   :  { %238 = vmatpush.bf16.msra.mxu2 %v372_v15 }
  0x1b   :  { %156 = vmatpush.bf16.msra.mxu1 %v363_v8 }
  0x1e   :  { %239 = vmatpush.bf16.msra.mxu2 %v371_v16 }
  0x1f   :  { %157 = vmatpush.bf16.msra.mxu1 %v362_v9 }
  0x22   :  { %240 = vmatpush.bf16.msra.mxu2 %v370_v23 }
  0x23   :  { %158 = vmatpush.bf16.msra.mxu1 %v361_v10 }
  0x26   :  { %241 = vmatpush.bf16.msra.mxu2 %v369_v24 }
  0x87   :  { %v77_v18 = vpop.f32.mrf.mxu0 }
  0x88   :  { %v78_v19 = vadd.f32 %v382_v17, %v77_v18 }
  0x8a   :  { %v81_v20 = vmax.f32 %v78_v19, 0.0 }
  0x8c   :  { %v82_v21 = vpack.c.bf16 %v81_v20, %v81_v20 }
  0x8e   :  { %159 = vmatmul.bf16.vlgmr.msra.gmra.mxu1 %v82_v21 }
  0x8f   :  { %v79_v22 = vpop.f32.mrf.mxu0 }
 0x10b   :  { %v160_v26 = vpop.f32.mrf.mxu1 }
 0x10c   :  { %v161_v27 = vadd.f32 %v383_v25, %v160_v26 }
 0x10e   :  { %v164_v28 = vmax.f32 %v161_v27, 0.0 }
 0x110   :  { %v165_v29 = vpack.c.bf16 %v164_v28, %v164_v28 }
 0x112   :  { %242 = vmatmul.bf16.vlgmr.msra.gmra.mxu2 %v165_v29 }
 0x113   :  { %v162_v30 = vpop.f32.mrf.mxu1 }
 0x195   :  { %v243_v32 = vpop.f32.mrf.mxu2 }
 0x196   :  { %v244_v33 = vadd.f32 %v384_v31, %v243_v32 }
 0x198   :  { %v248_v34 = vand.u32 2147483647, %v244_v33  ;;  %v247_v50 = vmax.f32 %v244_v33, 0.0 }
 0x19a   :  { %v249_v35 = vsub.f32 0.0, %v248_v34 }
 0x19c   :  { %v250_v36 = vmul.f32 1.442695, %v249_v35 }
 0x19d   :  { %v245_v37 = vpop.f32.mrf.mxu2 }
 0x19e   :  { %386 = vpow2.f32 %v250_v36 }
 0x1a4   :  { %v387_v39 = vpop.eup %386 }
 0x1a5   :  { %v252_v40 = vadd.f32 1.0, %v387_v39  ;;  %v255_v41 = vmul.f32 -0.5, %v387_v39  ;;  %v258_v45 = vand.u32 2147483647, %v387_v39 }
 0x1a7   :  { %388 = vlog2.f32 %v252_v40  ;;  %v256_v44 = vadd.f32 1.0, %v255_v41  ;;  %vm259_vm2 = vcmp.lt.f32.partialorder %v258_v45, 0.0004427343 }
 0x1a9   :  { %v257_v49 = vmul.f32 %v387_v39, %v256_v44 }
 0x1ad   :  { %v389_v47 = vpop.eup %388 }
 0x1ae   :  { %v254_v48 = vmul.f32 0.6931472, %v389_v47 }
 0x1b0   :  { %v260_v51 = vsel %vm259_vm2, %v257_v49, %v254_v48 }
 0x1b1   :  { %v261_v53 = vadd.f32 %v260_v51, %v247_v50 }
 0x1b3   :  { %v267_v54 = vsel %vm266_vm3, %v261_v53, %v244_v33 }
 0x1b4   :  { %v272_v55 = vadd.f32 %v385_v52, %v267_v54 }
 0x1b6   :  { %273 = vst.msk [vmem:[#allocation5] sm:$0xff] %vm64_vm0, %v272_v55 }
 0x1b7   :  { %284 = dma.vmem_to_hbm [thread:$0]  %s280_s30, 128, %s282_s12, [#allocation4]  }
 0x1b8   :  { %440 = dma.done.wait [#allocation4], 128  }
 0x1b9   :  { %441 = vsyncadd [#allocation4], 4294967168 }
 0x1ba   :  { %289 = vsyncpa [#allocation3], 1 }
 0x1bb   :  { %290 = vsyncpa [#allocation4], 1 }

// kernel: tpu_custom_call.1
= control target key start
LH: loop header
LB: loop body
LE: loop exit
PB: predicated region body
PF: predicated region fallthrough
CT: control target
= control target key end

     0   :  { %14 = vsyncpa [#allocation3], 0  ;;  %s571_s0 = inlined_call_operand.vmem [shape: f32[8,16], index: 0, kind: input, shape index: {}]   ;;  %s572_s1 = inlined_call_operand.hbm [shape: bf16[16,128], index: 1, kind: input, shape index: {}]   ;;  %s573_s2 = inlined_call_operand.vmem [shape: f32[1,128], index: 2, kind: input, shape index: {}]   ;;  %s574_s3 = inlined_call_operand.vmem [shape: bf16[128,128], index: 3, kind: input, shape index: {}]   ;;  %s575_s4 = inlined_call_operand.vmem [shape: f32[1,128], index: 4, kind: input, shape index: {}]   ;;  %s576_s5 = inlined_call_operand.vmem [shape: bf16[128,16], index: 5, kind: input, shape index: {}]   ;;  %s577_s6 = inlined_call_operand.vmem [shape: f32[1,16], index: 6, kind: input, shape index: {}]   ;;  %s578_s7 = inlined_call_operand.vmem [shape: f32[1,16], index: 7, kind: input, shape index: {}]   ;;  %s579_s8 = inlined_call_operand.vmem [shape: f32[1,16], index: 8, kind: input, shape index: {}]   ;;  %s580_s9 = inlined_call_operand.hbm [shape: f32[8,16], index: 9, kind: output, shape index: {}]  }
   0x1   :  { %15 = vsyncpa [#allocation4], 0  ;;  %s22_s11 = sshll.u32 %s572_s1, 4  ;;  %s442_s12 = smov [#allocation2]   ;;  %s23_s11 = int_to_ptr.hbm [resolvable:$true] %s22_s11 }
   0x2   :  { %s24_s13 = sshll.u32 %s442_s12, 4  ;;  %s443_s14 = smov 64   ;;  %s25_s13 = int_to_ptr.vmem [resolvable:$true] %s24_s13 }
   0x3   :  { %s444_s15 = smov 4  }
   0x4   :  { %30 = dma.hbm_to_vmem [thread:$0]  %s23_s11, 128, %s25_s13, [#allocation3], %s443_s14, %s443_s14, %s444_s15  }
   0x5   :  { %438 = dma.done.wait [#allocation3], 128  }
   0x6   :  { %439 = vsyncadd [#allocation3], 4294967168  ;;  %v360_v0 = vld [vmem:[#allocation2] sm:$0xff]  ;;  %v368_v2 = vld [vmem:[%s574_s3 + $0x38] sm:$0xff]  ;;  %vm64_vm0 = vcmask 130048   ;;  %v445_v42 = vmov 0  }
   0x7   :  { %v50_v1 = vld [vmem:[%s571_s0] sm:$0xff]  ;;  %75 = vmatpush.bf16.msra.mxu0 %v360_v0  ;;  %151 = vmatpush.bf16.msra.mxu1 %v368_v2  ;;  %v367_v4 = vld [vmem:[%s574_s3 + $0x30] sm:$0xff]  ;;  %v366_v5 = vld [vmem:[%s574_s3 + $0x28] sm:$0xff]  ;;  %s281_s12 = sshll.u32 %s580_s9, 4  ;;  %s282_s12 = int_to_ptr.hbm [resolvable:$true] %s281_s12 }
   0x8   :  { %v51_v3 = vpack.c.bf16 %v50_v1, %v50_v1  ;;  %v365_v6 = vld [vmem:[%s574_s3 + $0x20] sm:$0xff]  ;;  %v364_v7 = vld [vmem:[%s574_s3 + $0x18] sm:$0xff]  ;;  %v363_v8 = vld [vmem:[%s574_s3 + $0x10] sm:$0xff] }
   0x9   :  { %v362_v9 = vld [vmem:[%s574_s3 + $0x8] sm:$0xff]  ;;  %v361_v10 = vld [vmem:[%s574_s3] sm:$0xff]  ;;  %v376_v11 = vld [vmem:[%s576_s5 + $0x38] sm:$0xff] }
   0xa   :  { %295 = vmatmul.msk.bf16.vlgmr.msra.gmra.mxu0 %vm64_vm0, %v51_v3  ;;  %234 = vmatpush.bf16.msra.mxu2 %v376_v11  ;;  %v375_v12 = vld [vmem:[%s576_s5 + $0x30] sm:$0xff]  ;;  %v374_v13 = vld [vmem:[%s576_s5 + $0x28] sm:$0xff]  ;;  %v373_v14 = vld [vmem:[%s576_s5 + $0x20] sm:$0xff] }
   0xb   :  { %152 = vmatpush.bf16.msra.mxu1 %v367_v4  ;;  %v372_v15 = vld [vmem:[%s576_s5 + $0x18] sm:$0xff]  ;;  %v371_v16 = vld [vmem:[%s576_s5 + $0x10] sm:$0xff]  ;;  %v382_v17 = vld [vmem:[%s573_s2] ss:$0 sm:$0xff] }
   0xc   :  { %v370_v23 = vld [vmem:[%s576_s5 + $0x8] sm:$0xff]  ;;  %v369_v24 = vld [vmem:[%s576_s5] sm:$0xff] }
   0xd   :  { %v383_v25 = vld [vmem:[%s575_s4] ss:$0 sm:$0xff] }
   0xe   :  { %235 = vmatpush.bf16.msra.mxu2 %v375_v12  ;;  %v384_v31 = vld [vmem:[%s577_s6] ss:$0 sm:$0xff] }
   0xf   :  { %153 = vmatpush.bf16.msra.mxu1 %v366_v5  ;;  %v262_v38 = vld [vmem:[%s578_s7] sm:$0x1]  ;;  %s446_s7 = smov [#allocation5]  }
  0x10   :  { %vm263_vm1 = vcmp.ne.f32.partialorder %v262_v38, 0.0  ;;  %v385_v52 = vld [vmem:[%s579_s8] ss:$0 sm:$0xff]  ;;  %s279_s30 = sshll.u32 %s446_s7, 4  ;;  %s280_s30 = int_to_ptr.vmem [resolvable:$true] %s279_s30 }
  0x11   :  { %v264_v43 = vsel %vm263_vm1, 1, %v445_v42 }
  0x12   :  { %236 = vmatpush.bf16.msra.mxu2 %v374_v13  ;;  %v265_v46 = vperm.slane %v264_v43, 0 }
  0x13   :  { %154 = vmatpush.bf16.msra.mxu1 %v365_v6 }
  0x14   :  { %vm266_vm3 = vcmp.eq.s32.totalorder %v265_v46, 1 }
  0x16   :  { %237 = vmatpush.bf16.msra.mxu2 %v373_v14 }
  0x17   :  { %155 = vmatpush.bf16.msra.mxu1 %v364_v7 }
  0x1a   :  { %238 = vmatpush.bf16.msra.mxu2 %v372_v15 }
  0x1b   :  { %156 = vmatpush.bf16.msra.mxu1 %v363_v8 }
  0x1e   :  { %239 = vmatpush.bf16.msra.mxu2 %v371_v16 }
  0x1f   :  { %157 = vmatpush.bf16.msra.mxu1 %v362_v9 }
  0x22   :  { %240 = vmatpush.bf16.msra.mxu2 %v370_v23 }
  0x23   :  { %158 = vmatpush.bf16.msra.mxu1 %v361_v10 }
  0x26   :  { %241 = vmatpush.bf16.msra.mxu2 %v369_v24 }
  0x87   :  { %v77_v18 = vpop.f32.mrf.mxu0 }
  0x88   :  { %v78_v19 = vadd.f32 %v382_v17, %v77_v18 }
  0x8a   :  { %v81_v20 = vmax.f32 %v78_v19, 0.0 }
  0x8c   :  { %v82_v21 = vpack.c.bf16 %v81_v20, %v81_v20 }
  0x8e   :  { %159 = vmatmul.bf16.vlgmr.msra.gmra.mxu1 %v82_v21 }
  0x8f   :  { %v79_v22 = vpop.f32.mrf.mxu0 }
 0x10b   :  { %v160_v26 = vpop.f32.mrf.mxu1 }
 0x10c   :  { %v161_v27 = vadd.f32 %v383_v25, %v160_v26 }
 0x10e   :  { %v164_v28 = vmax.f32 %v161_v27, 0.0 }
 0x110   :  { %v165_v29 = vpack.c.bf16 %v164_v28, %v164_v28 }
 0x112   :  { %242 = vmatmul.bf16.vlgmr.msra.gmra.mxu2 %v165_v29 }
 0x113   :  { %v162_v30 = vpop.f32.mrf.mxu1 }
 0x195   :  { %v243_v32 = vpop.f32.mrf.mxu2 }
 0x196   :  { %v244_v33 = vadd.f32 %v384_v31, %v243_v32 }
 0x198   :  { %v248_v34 = vand.u32 2147483647, %v244_v33  ;;  %v247_v50 = vmax.f32 %v244_v33, 0.0 }
 0x19a   :  { %v249_v35 = vsub.f32 0.0, %v248_v34 }
 0x19c   :  { %v250_v36 = vmul.f32 1.442695, %v249_v35 }
 0x19d   :  { %v245_v37 = vpop.f32.mrf.mxu2 }
 0x19e   :  { %386 = vpow2.f32 %v250_v36 }
 0x1a4   :  { %v387_v39 = vpop.eup %386 }
 0x1a5   :  { %v252_v40 = vadd.f32 1.0, %v387_v39  ;;  %v255_v41 = vmul.f32 -0.5, %v387_v39  ;;  %v258_v45 = vand.u32 2147483647, %v387_v39 }
 0x1a7   :  { %388 = vlog2.f32 %v252_v40  ;;  %v256_v44 = vadd.f32 1.0, %v255_v41  ;;  %vm259_vm2 = vcmp.lt.f32.partialorder %v258_v45, 0.0004427343 }
 0x1a9   :  { %v257_v49 = vmul.f32 %v387_v39, %v256_v44 }
 0x1ad   :  { %v389_v47 = vpop.eup %388 }
 0x1ae   :  { %v254_v48 = vmul.f32 0.6931472, %v389_v47 }
 0x1b0   :  { %v260_v51 = vsel %vm259_vm2, %v257_v49, %v254_v48 }
 0x1b1   :  { %v261_v53 = vadd.f32 %v260_v51, %v247_v50 }
 0x1b3   :  { %v267_v54 = vsel %vm266_vm3, %v261_v53, %v244_v33 }
 0x1b4   :  { %v272_v55 = vadd.f32 %v385_v52, %v267_v54 }
 0x1b6   :  { %273 = vst.msk [vmem:[#allocation5] sm:$0xff] %vm64_vm0, %v272_v55 }
 0x1b7   :  { %284 = dma.vmem_to_hbm [thread:$0]  %s280_s30, 128, %s282_s12, [#allocation4]  }
 0x1b8   :  { %440 = dma.done.wait [#allocation4], 128  }
 0x1b9   :  { %441 = vsyncadd [#allocation4], 4294967168 }
 0x1ba   :  { %289 = vsyncpa [#allocation3], 1 }
 0x1bb   :  { %290 = vsyncpa [#allocation4], 1 }

</bundles_post_ra>
